<compile_context>
chip_gen: v5e
topology: v5e:2x2
jax: 0.10.0
libtpu: 0.0.40
codegen_flags: <defaults>
</compile_context>

<pallas_src>
import math

import jax
import jax.numpy as jnp
from jax.experimental import pallas as pl
from jax.experimental.pallas import tpu as pltpu


_MIN_GOOD_ROWS = 256  # row-tile target for decent weight reuse before we give
                      # up on the fused path and tile the vocab instead.


# ---------------------------------------------------------------------------
# Kernels
# ---------------------------------------------------------------------------

def _fused_kernel_inplace(x_ref, w_ref, b_ref, o_ref):
    """Fused matmul + log-softmax; fp32 o_ref doubles as the accumulator.

    x_ref: (RT, TK)  w_ref: (TK, V)  b_ref: (1, V)  o_ref: (RT, V) fp32.
    """
    k = pl.program_id(1)
    part = jnp.dot(x_ref[...], w_ref[...], preferred_element_type=jnp.float32)

    @pl.when(k == 0)
    def _():
        o_ref[...] = part                      # direct write, no zero-init pass

    @pl.when(k > 0)
    def _():
        o_ref[...] += part

    @pl.when(k == pl.num_programs(1) - 1)
    def _():
        logits = o_ref[...] + b_ref[...].astype(jnp.float32)
        m = jnp.max(logits, axis=-1, keepdims=True)
        shifted = logits - m
        lse = jnp.log(jnp.sum(jnp.exp(shifted), axis=-1, keepdims=True))
        o_ref[...] = shifted - lse


def _fused_kernel_scratch(x_ref, w_ref, b_ref, o_ref, acc_ref):
    """Same as above, explicit fp32 accumulator (for non-fp32 outputs)."""
    k = pl.program_id(1)
    part = jnp.dot(x_ref[...], w_ref[...], preferred_element_type=jnp.float32)

    @pl.when(k == 0)
    def _():
        acc_ref[...] = part

    @pl.when(k > 0)
    def _():
        acc_ref[...] += part

    @pl.when(k == pl.num_programs(1) - 1)
    def _():
        logits = acc_ref[...] + b_ref[...].astype(jnp.float32)
        m = jnp.max(logits, axis=-1, keepdims=True)
        shifted = logits - m
        lse = jnp.log(jnp.sum(jnp.exp(shifted), axis=-1, keepdims=True))
        o_ref[...] = (shifted - lse).astype(o_ref.dtype)


def _vocab_tiled_kernel(x_ref, w_ref, b_ref, logits_ref, lse_ref,
                        acc_ref, m_ref, l_ref):
    """Vocab-tiled projection with online logsumexp.

    Grid = (row_tiles, vocab_tiles, k_tiles).
    x_ref: (RT, TK)   w_ref: (TK, VT)   b_ref: (1, VT)
    logits_ref: (RT, VT)   lse_ref: (RT, 1) fp32
    acc_ref: (RT, VT) fp32   m_ref / l_ref: (RT, 1) fp32 running max / sum-exp.
    """
    j = pl.program_id(1)
    k = pl.program_id(2)
    part = jnp.dot(x_ref[...], w_ref[...], preferred_element_type=jnp.float32)

    @pl.when(k == 0)
    def _():
        acc_ref[...] = part

    @pl.when(k > 0)
    def _():
        acc_ref[...] += part

    @pl.when(k == pl.num_programs(2) - 1)
    def _():
        logits = acc_ref[...] + b_ref[...].astype(jnp.float32)
        logits_ref[...] = logits.astype(logits_ref.dtype)
        tile_max = jnp.max(logits, axis=-1, keepdims=True)

        @pl.when(j == 0)
        def _():
            m_ref[...] = tile_max
            l_ref[...] = jnp.sum(jnp.exp(logits - tile_max), axis=-1,
                                 keepdims=True)

        @pl.when(j > 0)
        def _():
            m_new = jnp.maximum(m_ref[...], tile_max)
            l_ref[...] = (l_ref[...] * jnp.exp(m_ref[...] - m_new)
                          + jnp.sum(jnp.exp(logits - m_new), axis=-1,
                                    keepdims=True))
            m_ref[...] = m_new

        @pl.when(j == pl.num_programs(1) - 1)
        def _():
            lse_ref[...] = m_ref[...] + jnp.log(l_ref[...])


# ---------------------------------------------------------------------------
# Planning helpers
# ---------------------------------------------------------------------------

def _round_up(x, m):
    return ((x + m - 1) // m) * m


def _vmem_budget_bytes():
    """Generation-aware VMEM budget; also passed to CompilerParams."""
    try:
        cap = int(pltpu.get_tpu_info().vmem_capacity_bytes)
    except Exception:  # off-TPU / older attribute name -> conservative default
        cap = 64 << 20
    # ~75% of physical (~96 MiB on v5e/v6e, ~48 MiB on v7x), headroom for the
    # compiler's own scratch.
    return max(16 << 20, min(int(cap * 0.75), 112 << 20))


def _k_candidates(d, max_bk=2048):
    """K-tile candidates: full d_model or 128-multiple divisors (lane rules)."""
    cands = []
    if d <= max_bk:
        cands.append(d)
    for c in (2048, 1024, 512, 256, 128):
        if c < d and d % c == 0:
            cands.append(c)
    if not cands:
        cands.append(d)            # awkward d_model: single K step
    return cands


def _v_candidates(v, max_bv=4096):
    """Vocab-tile candidates: 128-multiple divisors of V (lane-dense output)."""
    cands = [c for c in (4096, 2048, 1024, 512, 256, 128)
             if c <= v and v % c == 0]
    if v <= max_bv and v not in cands:
        cands.insert(0, v)
    if not cands:
        cands = [v]
    return cands


def _plan_fused(rows, d, v, xb, wb, ob, budget, use_scratch):
    """Pick (row_tile, k_tile) for the fused path; None if nothing fits."""
    rows8 = _round_up(max(rows, 1), 8)
    best = None
    for tk in _k_candidates(d):
        fixed = 2 * tk * v * wb + 2 * v * 4                 # weight + bias dbuf
        per_row = 2 * tk * xb + 2 * v * ob + (v * 4 if use_scratch else 0)
        avail = budget - fixed
        if avail < 8 * per_row:
            continue
        rt = min(rows8, (avail // per_row) // 8 * 8)
        if best is None or rt > best[0]:
            best = (rt, tk)
        if rt >= rows8:
            break
    return best


def _plan_vocab_tiled(rows, d, v, xb, wb, ob, budget):
    """Pick (row_tile, k_tile, vocab_tile) for the vocab-tiled path."""
    rows8 = _round_up(max(rows, 1), 8)
    best = None
    for vt in _v_candidates(v):
        for tk in _k_candidates(d):
            fixed = 2 * tk * vt * wb + 2 * vt * 4
            per_row = (2 * tk * xb + 2 * vt * ob + vt * 4   # x, logits, acc
                       + 3 * 128 * 4)                        # lse out + m/l
            avail = budget - fixed
            if avail < 8 * per_row:
                continue
            rt = min(rows8, (avail // per_row) // 8 * 8)
            score = (min(rt, _MIN_GOOD_ROWS), vt, tk)
            if best is None or score > best[0]:
                best = (score, (rt, tk, vt))
    return None if best is None else best[1]


# ---------------------------------------------------------------------------
# pallas_call drivers
# ---------------------------------------------------------------------------

def _run_fused(x2, wT, b2, out_dtype, rt, tk, budget):
    rows, d = x2.shape
    v = wT.shape[1]
    use_scratch = jnp.dtype(out_dtype) != jnp.dtype(jnp.float32)
    kernel = _fused_kernel_scratch if use_scratch else _fused_kernel_inplace
    scratch = [pltpu.VMEM((rt, v), jnp.float32)] if use_scratch else []
    grid = (pl.cdiv(rows, rt), d // tk)
    return pl.pallas_call(
        kernel,
        out_shape=jax.ShapeDtypeStruct((rows, v), out_dtype),
        grid_spec=pltpu.PrefetchScalarGridSpec(
            num_scalar_prefetch=0,
            grid=grid,
            in_specs=[
                pl.BlockSpec((rt, tk), lambda i, k: (i, k)),   # activations
                pl.BlockSpec((tk, v), lambda i, k: (k, 0)),    # W^T (d_model, V)
                pl.BlockSpec((1, v), lambda i, k: (0, 0)),     # bias
            ],
            out_specs=pl.BlockSpec((rt, v), lambda i, k: (i, 0)),
            scratch_shapes=scratch,
        ),
        compiler_params=pltpu.CompilerParams(
            dimension_semantics=("parallel", "arbitrary"),
            vmem_limit_bytes=int(budget),
        ),
    )(x2, wT, b2)


def _run_vocab_tiled(x2, wT, b2, out_dtype, rt, tk, vt, budget):
    rows, d = x2.shape
    v = wT.shape[1]
    grid = (pl.cdiv(rows, rt), v // vt, d // tk)
    logits, lse = pl.pallas_call(
        _vocab_tiled_kernel,
        out_shape=(jax.ShapeDtypeStruct((rows, v), out_dtype),
                   jax.ShapeDtypeStruct((rows, 1), jnp.float32)),
        grid_spec=pltpu.PrefetchScalarGridSpec(
            num_scalar_prefetch=0,
            grid=grid,
            in_specs=[
                pl.BlockSpec((rt, tk), lambda i, j, k: (i, k)),
                pl.BlockSpec((tk, vt), lambda i, j, k: (k, j)),
                pl.BlockSpec((1, vt), lambda i, j, k: (0, j)),
            ],
            out_specs=[
                pl.BlockSpec((rt, vt), lambda i, j, k: (i, j)),
                pl.BlockSpec((rt, 1), lambda i, j, k: (i, 0)),
            ],
            scratch_shapes=[
                pltpu.VMEM((rt, vt), jnp.float32),
                pltpu.VMEM((rt, 1), jnp.float32),
                pltpu.VMEM((rt, 1), jnp.float32),
            ],
        ),
        compiler_params=pltpu.CompilerParams(
            dimension_semantics=("parallel", "arbitrary", "arbitrary"),
            vmem_limit_bytes=int(budget),
        ),
    )(x2, wT, b2)
    # Once the vocab is tiled, lse is only known after the last vocab tile has
    # been written back, so one extra elementwise pass applies the shift.
    return (logits.astype(jnp.float32) - lse).astype(out_dtype)


# ---------------------------------------------------------------------------
# Public wrapper (matches ProjectionLayer.forward)
# ---------------------------------------------------------------------------

def projection_layer(x, weight, bias, *, mode="auto", block_rows=None,
                     block_k=None, block_v=None, matmul_dtype=None,
                     vmem_budget_bytes=None):
    """log_softmax(x @ weight.T + bias, axis=-1).

    x: (..., d_model); weight: (vocab, d_model); bias: (vocab,).
    matmul_dtype: optionally cast x/weight (e.g. jnp.bfloat16) for the MXU
    while keeping the bias add + log-softmax epilogue in fp32.
    """
    lead = x.shape[:-1]
    d = x.shape[-1]
    v = weight.shape[0]
    rows = math.prod(lead) if lead else 1
    out_dtype = x.dtype

    x2 = x.reshape(rows, d)
    wT = weight.T                     # (d_model, vocab): MXU-native, contiguous DMA
    b2 = bias.reshape(1, v)
    if matmul_dtype is not None:
        x2 = x2.astype(matmul_dtype)
        wT = wT.astype(matmul_dtype)

    budget = int(vmem_budget_bytes) if vmem_budget_bytes else _vmem_budget_bytes()
    xb = jnp.dtype(x2.dtype).itemsize
    wb = jnp.dtype(wT.dtype).itemsize
    ob = jnp.dtype(out_dtype).itemsize
    use_scratch = jnp.dtype(out_dtype) != jnp.dtype(jnp.float32)
    rows8 = _round_up(max(rows, 1), 8)

    fused_plan = _plan_fused(rows, d, v, xb, wb, ob, budget, use_scratch)
    if mode == "fused":
        chosen = "fused"
    elif mode == "vocab_tiled":
        chosen = "vocab_tiled"
    else:
        good = fused_plan is not None and fused_plan[0] >= min(rows8, _MIN_GOOD_ROWS)
        chosen = "fused" if good else "vocab_tiled"

    if chosen == "fused":
        if fused_plan is None:
            fused_plan = (min(rows8, 8), _k_candidates(d)[-1])
        rt, tk = fused_plan
        rt = block_rows or rt
        tk = block_k or tk
        if d % tk:
            raise ValueError(f"block_k={tk} must divide d_model={d}")
        out = _run_fused(x2, wT, b2, out_dtype, rt, tk, budget)
    else:
        plan = _plan_vocab_tiled(rows, d, v, xb, wb, ob, budget)
        if plan is None:
            plan = (min(rows8, 8), _k_candidates(d)[-1], _v_candidates(v)[-1])
        rt, tk, vt = plan
        rt = block_rows or rt
        tk = block_k or tk
        vt = block_v or vt
        if d % tk or v % vt:
            raise ValueError("block_k / block_v must divide d_model / vocab")
        out = _run_vocab_tiled(x2, wT, b2, out_dtype, rt, tk, vt, budget)

    return out.reshape(*lead, v)


# ---------------------------------------------------------------------------
# Self-test
# ---------------------------------------------------------------------------

if __name__ == "__main__":
    key = jax.random.PRNGKey(0)

    def make_params(kw, kb, d, v, dtype):
        # nn.Linear default init: uniform(-1/sqrt(d_model), 1/sqrt(d_model)).
        bound = 1.0 / math.sqrt(d)
        w = jax.random.uniform(kw, (v, d), dtype=jnp.float32,
                               minval=-bound, maxval=bound).astype(dtype)
        b = jax.random.uniform(kb, (v,), dtype=jnp.float32,
                               minval=-bound, maxval=bound)
        return w, b

    def reference(x, w, b):
        logits = (x.astype(jnp.float32) @ w.astype(jnp.float32).T
                  + b.astype(jnp.float32))
        return jax.nn.log_softmax(logits, axis=-1)

    # 1) Canonical small shape, fp32, auto -> fused path, in-place fp32 acc.
    B, S, D, V = 2, 8, 32, 128
    k1, k2, k3, key = jax.random.split(key, 4)
    x = jax.random.normal(k1, (B, S, D), dtype=jnp.float32)
    w, b = make_params(k2, k3, D, V, jnp.float32)
    y = jax.block_until_ready(projection_layer(x, w, b))
    assert y.shape == (B, S, V)
    assert jnp.allclose(y, reference(x, w, b), atol=1e-5, rtol=1e-5), "test1"

    # 2) Vocab-tiled online-logsumexp path: 2 K tiles x 2 vocab tiles, fp32.
    B, S, D, V = 2, 8, 256, 256
    k1, k2, k3, key = jax.random.split(key, 4)
    x = jax.random.normal(k1, (B, S, D), dtype=jnp.float32)
    w, b = make_params(k2, k3, D, V, jnp.float32)
    y = jax.block_until_ready(
        projection_layer(x, w, b, mode="vocab_tiled", block_k=128, block_v=128))
    assert y.shape == (B, S, V)
    assert jnp.allclose(y, reference(x, w, b), atol=2e-3, rtol=2e-3), "test2"

    # 3) bf16 activations/weights: fused path with fp32 scratch acc, 2 K tiles.
    B, S, D, V = 2, 8, 256, 128
    k1, k2, k3, key = jax.random.split(key, 4)
    x = jax.random.normal(k1, (B, S, D), dtype=jnp.bfloat16)
    w, b = make_params(k2, k3, D, V, jnp.bfloat16)
    y = jax.block_until_ready(
        projection_layer(x, w, b, mode="fused", block_k=128))
    assert y.shape == (B, S, V)
    assert jnp.allclose(y.astype(jnp.float32), reference(x, w, b),
                        atol=5e-2, rtol=5e-2), "test3"

    print("KERNEL_OK")
</pallas_src>

<mosaic_0001>
module attributes {stable_mosaic.version = 11 : i64} {
  func.func @_fused_kernel_inplace(%arg0: i32, %arg1: i32, %arg2: memref<16x32xf32, #tpu.memory_space<vmem>>, %arg3: memref<32x128xf32, #tpu.memory_space<vmem>>, %arg4: memref<1x128xf32, #tpu.memory_space<vmem>>, %arg5: memref<16x128xf32, #tpu.memory_space<vmem>>) attributes {dimension_semantics = [#tpu.dimension_semantics<parallel>, #tpu.dimension_semantics<arbitrary>], iteration_bounds = array<i64: 1, 1>, scalar_prefetch = 0 : i64, scratch_operands = 0 : i64, tpu.core_type = #tpu.core_type<tc>, window_params = [{transform_indices = @transform_0, window_bounds = array<i64: 16, 32>}, {transform_indices = @transform_1, window_bounds = array<i64: 32, 128>}, {pipeline_mode = #tpu.pipeline_mode<synchronous>, transform_indices = @transform_2, window_bounds = array<i64: 1, 128>}, {transform_indices = @transform_3, window_bounds = array<i64: 16, 128>}]} {
    %c0 = arith.constant 0 : index
    %c0_0 = arith.constant 0 : index
    %0 = vector.load %arg2[%c0, %c0_0] : memref<16x32xf32, #tpu.memory_space<vmem>>, vector<16x32xf32>
    %c0_1 = arith.constant 0 : index
    %c0_2 = arith.constant 0 : index
    %1 = vector.load %arg3[%c0_1, %c0_2] : memref<32x128xf32, #tpu.memory_space<vmem>>, vector<32x128xf32>
    %cst = arith.constant dense<0.000000e+00> : vector<16x128xf32>
    %2 = tpu.matmul %0, %1, %cst {dimension_numbers = #tpu.dot_dimension_numbers<[1], [0], [0], [1], [0, 0, 1, 1], [], []>} : vector<16x32xf32>, vector<32x128xf32>, vector<16x128xf32> -> vector<16x128xf32>
    %c0_i32 = arith.constant 0 : i32
    %3 = arith.cmpi eq, %arg1, %c0_i32 : i32
    %4 = arith.extui %3 : i1 to i32
    %c0_i32_3 = arith.constant 0 : i32
    %5 = arith.cmpi ne, %4, %c0_i32_3 : i32
    scf.if %5 {
      %c0_8 = arith.constant 0 : index
      %c0_9 = arith.constant 0 : index
      %12 = vector.load %arg5[%c0_8, %c0_9] : memref<16x128xf32, #tpu.memory_space<vmem>>, vector<16x128xf32>
      tpu.vector_store %arg5[%c0_8, %c0_9], %2 {strides = array<i32>} : memref<16x128xf32, #tpu.memory_space<vmem>>, vector<16x128xf32>,
    } else {
    }
    %c0_i32_4 = arith.constant 0 : i32
    %6 = arith.cmpi sgt, %arg1, %c0_i32_4 : i32
    %7 = arith.extui %6 : i1 to i32
    %c0_i32_5 = arith.constant 0 : i32
    %8 = arith.cmpi ne, %7, %c0_i32_5 : i32
    scf.if %8 {
      %c0_8 = arith.constant 0 : index
      %c0_9 = arith.constant 0 : index
      %12 = vector.load %arg5[%c0_8, %c0_9] : memref<16x128xf32, #tpu.memory_space<vmem>>, vector<16x128xf32>
      %13 = arith.addf %12, %2 : vector<16x128xf32>
      %c0_10 = arith.constant 0 : index
      %c0_11 = arith.constant 0 : index
      %14 = vector.load %arg5[%c0_10, %c0_11] : memref<16x128xf32, #tpu.memory_space<vmem>>, vector<16x128xf32>
      tpu.vector_store %arg5[%c0_10, %c0_11], %13 {strides = array<i32>} : memref<16x128xf32, #tpu.memory_space<vmem>>, vector<16x128xf32>,
    } else {
    }
    %c0_i32_6 = arith.constant 0 : i32
    %9 = arith.cmpi eq, %arg1, %c0_i32_6 : i32
    %10 = arith.extui %9 : i1 to i32
    %c0_i32_7 = arith.constant 0 : i32
    %11 = arith.cmpi ne, %10, %c0_i32_7 : i32
    scf.if %11 {
      %c0_8 = arith.constant 0 : index
      %c0_9 = arith.constant 0 : index
      %12 = vector.load %arg5[%c0_8, %c0_9] : memref<16x128xf32, #tpu.memory_space<vmem>>, vector<16x128xf32>
      %c0_10 = arith.constant 0 : index
      %c0_11 = arith.constant 0 : index
      %13 = vector.load %arg4[%c0_10, %c0_11] : memref<1x128xf32, #tpu.memory_space<vmem>>, vector<1x128xf32>
      %14 = vector.broadcast %13 : vector<1x128xf32> to vector<16x128xf32>
      %15 = arith.addf %12, %14 : vector<16x128xf32>
      %cst_12 = arith.constant dense<0xFF800000> : vector<16xf32>
      %16 = vector.multi_reduction <maximumf>, %15, %cst_12 [1] : vector<16x128xf32> to vector<16xf32>
      %17 = vector.shape_cast %16 : vector<16xf32> to vector<16x1xf32>
      %18 = vector.broadcast %17 : vector<16x1xf32> to vector<16x128xf32>
      %19 = arith.subf %15, %18 : vector<16x128xf32>
      %20 = math.exp %19 : vector<16x128xf32>
      %cst_13 = arith.constant dense<0.000000e+00> : vector<16xf32>
      %21 = vector.multi_reduction <add>, %20, %cst_13 [1] : vector<16x128xf32> to vector<16xf32>
      %22 = vector.shape_cast %21 : vector<16xf32> to vector<16x1xf32>
      %23 = math.log %22 : vector<16x1xf32>
      %24 = vector.broadcast %23 : vector<16x1xf32> to vector<16x128xf32>
      %25 = arith.subf %19, %24 : vector<16x128xf32>
      %c0_14 = arith.constant 0 : index
      %c0_15 = arith.constant 0 : index
      %26 = vector.load %arg5[%c0_14, %c0_15] : memref<16x128xf32, #tpu.memory_space<vmem>>, vector<16x128xf32>
      tpu.vector_store %arg5[%c0_14, %c0_15], %25 {strides = array<i32>} : memref<16x128xf32, #tpu.memory_space<vmem>>, vector<16x128xf32>,
    } else {
    }
    return
  }
  func.func @transform_0(%arg0: i32, %arg1: i32) -> (i32, i32) {
    %c0_i32 = arith.constant 0 : i32
    return %arg0, %arg1 : i32, i32
  }
  func.func @transform_1(%arg0: i32, %arg1: i32) -> (i32, i32) {
    %c0_i32 = arith.constant 0 : i32
    %c0_i32_0 = arith.constant 0 : i32
    return %arg1, %c0_i32 : i32, i32
  }
  func.func @transform_2(%arg0: i32, %arg1: i32) -> (i32, i32) {
    %c0_i32 = arith.constant 0 : i32
    %c0_i32_0 = arith.constant 0 : i32
    %c0_i32_1 = arith.constant 0 : i32
    return %c0_i32, %c0_i32_0 : i32, i32
  }
  func.func @transform_3(%arg0: i32, %arg1: i32) -> (i32, i32) {
    %c0_i32 = arith.constant 0 : i32
    %c0_i32_0 = arith.constant 0 : i32
    return %arg0, %c0_i32 : i32, i32
  }
}

</mosaic_0001>

<bundles_post_ra>
// kernel: tpu_custom_call.1
= control target key start
LH: loop header
LB: loop body
LE: loop exit
PB: predicated region body
PF: predicated region fallthrough
CT: control target
= control target key end

     0   :  { %8 = vsyncpa [#allocation3], 0  ;;  %s296_s0 = inlined_call_operand.hbm [shape: f32[16,32], index: 0, kind: input, shape index: {}]   ;;  %s297_s1 = inlined_call_operand.hbm [shape: f32[32,128], index: 1, kind: input, shape index: {}]   ;;  %s298_s2 = inlined_call_operand.vmem [shape: f32[1,128], index: 2, kind: input, shape index: {}]   ;;  %s299_s3 = inlined_call_operand.hbm [shape: f32[16,128], index: 3, kind: output, shape index: {}]  }
   0x1   :  { %9 = vsyncpa [#allocation6], 0 }
   0x2   :  { %10 = vsyncpa [#allocation4], 0  ;;  %s15_s14 = sshll.u32 %s296_s0, 4  ;;  %s250_s15 = smov [#allocation2]   ;;  %s16_s14 = int_to_ptr.hbm [resolvable:$true] %s15_s14 }
   0x3   :  { %s17_s16 = sshll.u32 %s250_s15, 4  ;;  %s28_s19 = sshll.u32 %s297_s1, 4  ;;  %s18_s16 = int_to_ptr.vmem [resolvable:$true] %s17_s16  ;;  %s29_s19 = int_to_ptr.hbm [resolvable:$true] %s28_s19 }
   0x4   :  { %s251_s20 = smov 128   ;;  %s252_s21 = smov 8  }
   0x5   :  { %23 = dma.hbm_to_vmem [thread:$0]  %s16_s14, 256, %s18_s16, [#allocation3], %s251_s20, %s251_s20, %s252_s21  }
   0x6   :  { %s253_s22 = smov [#allocation5]  }
   0x7   :  { %s30_s23 = sshll.u32 %s253_s22, 4  ;;  %s31_s23 = int_to_ptr.vmem [resolvable:$true] %s30_s23 }
   0x8   :  { %36 = dma.hbm_to_vmem [thread:$0]  %s29_s19, 512, %s31_s23, [#allocation6], %s251_s20, %s251_s20, %s252_s21  }
   0x9   :  { %244 = dma.done.wait [#allocation3], 256  }
   0xa   :  { %245 = vsyncadd [#allocation3], 4294967040 }
   0xb   :  { %246 = dma.done.wait [#allocation6], 512  }
   0xc   :  { %247 = vsyncadd [#allocation6], 4294966784  ;;  %v52_v0 = vld [vmem:[#allocation5 + $0x18] sm:$0xff]  ;;  %v51_v1 = vld [vmem:[#allocation5 + $0x10] sm:$0xff]  ;;  %vm53_vm0 = vcmask 261120   ;;  %s138_s27 = sshll.u32 %s299_s3, 4  ;;  %s139_s27 = int_to_ptr.hbm [resolvable:$true] %s138_s27 }
   0xd   :  { %72 = vmatpush.msra.mxu0 %v52_v0  ;;  %154 = vmatpush.msra.mxu1 %v52_v0  ;;  %v50_v2 = vld [vmem:[#allocation5 + $0x8] sm:$0xff]  ;;  %v49_v3 = vld [vmem:[#allocation5] sm:$0xff]  ;;  %v47_v4 = vld [vmem:[#allocation2] sm:$0xff] }
   0xe   :  { %v48_v5 = vld [vmem:[#allocation2 + $0x8] sm:$0xff]  ;;  %v163_v6 = vld [vmem:[%s298_s2] ss:$0 sm:$0xff]  ;;  %s254_s2 = smov [#allocation7]  }
   0xf   :  { %73 = vmatpush.msra.mxu0 %v51_v1  ;;  %155 = vmatpush.msra.mxu1 %v51_v1  ;;  %s136_s24 = sshll.u32 %s254_s2, 4  ;;  %s137_s24 = int_to_ptr.vmem [resolvable:$true] %s136_s24 }
  0x11   :  { %74 = vmatpush.msra.mxu0 %v50_v2  ;;  %156 = vmatpush.msra.mxu1 %v50_v2 }
  0x13   :  { %75 = vmatpush.msra.mxu0 %v49_v3  ;;  %157 = vmatpush.msra.mxu1 %v49_v3 }
  0x14   :  { %152 = vmatmul.msk.f32.vlgmr.msra.gmra.mxu0 %vm53_vm0, %v47_v4  ;;  %153 = vmatmul.msk.f32.vlgmr.msra.gmra.mxu1 %vm53_vm0, %v48_v5 }
  0x91   :  { %v77_v7 = vpop.f32.mrf.mxu0  ;;  %v80_v9 = vpop.f32.mrf.mxu1 }
  0x92   :  { %v108_v8 = vadd.f32 %v163_v6, %v77_v7  ;;  %v109_v10 = vadd.f32 %v163_v6, %v80_v9 }
  0x94   :  { %110 = vmax.xlane.f32.xlu0 %v108_v8 }
  0x9c   :  { %112 = vmax.xlane.f32.xlu0 %v109_v10 }
 0x107   :  { %v111_v11 = vpop.xlane.xlu0 %110 }
 0x108   :  { %v114_v12 = vsub.f32 %v108_v8, %v111_v11 }
 0x10a   :  { %v116_v13 = vmul.f32 1.442695, %v114_v12 }
 0x10c   :  { %164 = vpow2.f32 %v116_v13 }
 0x10f   :  { %v113_v14 = vpop.xlane.xlu0 %112 }
 0x110   :  { %v115_v15 = vsub.f32 %v109_v10, %v113_v14 }
 0x112   :  { %v165_v16 = vpop.eup %164  ;;  %v118_v17 = vmul.f32 1.442695, %v115_v15 }
 0x113   :  { %120 = vadd.xlane.f32.xlu1 %v165_v16 }
 0x114   :  { %166 = vpow2.f32 %v118_v17 }
 0x11a   :  { %v167_v18 = vpop.eup %166 }
 0x11b   :  { %122 = vadd.xlane.f32.xlu1 %v167_v18 }
 0x186   :  { %v121_v19 = vpop.xlane.xlu1 %120 }
 0x187   :  { %168 = vlog2.f32 %v121_v19 }
 0x18d   :  { %v169_v20 = vpop.eup %168 }
 0x18e   :  { %v125_v21 = vmul.f32 0.6931472, %v169_v20  ;;  %v123_v22 = vpop.xlane.xlu1 %122 }
 0x18f   :  { %170 = vlog2.f32 %v123_v22 }
 0x190   :  { %v128_v23 = vsub.f32 %v114_v12, %v125_v21 }
 0x192   :  { %130 = vst [vmem:[#allocation7] sm:$0xff] %v128_v23 }
 0x195   :  { %v171_v24 = vpop.eup %170 }
 0x196   :  { %v127_v25 = vmul.f32 0.6931472, %v171_v24 }
 0x198   :  { %v129_v26 = vsub.f32 %v115_v15, %v127_v25 }
 0x19a   :  { %131 = vst [vmem:[#allocation7 + $0x8] sm:$0xff] %v129_v26 }
 0x19b   :  { %144 = dma.vmem_to_hbm [thread:$0]  %s137_s24, 256, %s139_s27, [#allocation4], %s251_s20, %s251_s20, %s252_s21  }
 0x19c   :  { %248 = dma.done.wait [#allocation4], 256  }
 0x19d   :  { %249 = vsyncadd [#allocation4], 4294967040 }
 0x19e   :  { %149 = vsyncpa [#allocation3], 1 }
 0x19f   :  { %150 = vsyncpa [#allocation6], 1 }
 0x1a0   :  { %151 = vsyncpa [#allocation4], 1 }

</bundles_post_ra>
